<compile_context>
chip_gen: v5e
topology: v5e:2x2
jax: 0.10.0
libtpu: 0.0.40
codegen_flags: <defaults>
</compile_context>

<pallas_src>
import jax
import jax.numpy as jnp
import numpy as np
from jax.experimental import pallas as pl
from jax.experimental.pallas import tpu as pltpu


def _lstm_encoder_kernel(tok_ref,             # SMEM (1,) int32   (scalar prefetch)
                         emb_ref,             # (1, 1, H)   embedding row of `token`
                         h_ref, c_ref,        # (L, 1, H)   hidden / cell state
                         wih_ref, whh_ref,    # (L, H, 4H)  fused gate weights [i,f,g,o]
                         b_ref,               # (L, 1, 4H)  pre-summed biases
                         h_new_ref,           # (L, 1, H)
                         c_new_ref):          # (L, 1, H)
    num_layers, _, H = h_ref.shape

    x = emb_ref[0].astype(jnp.float32)        # (1, H) layer-0 input (embedded token)

    # Layers are strictly sequential; static unroll keeps everything visible to the
    # scheduler and avoids any grid/pipeline overhead.
    for l in range(num_layers):
        h = h_ref[l].astype(jnp.float32)      # (1, H)
        c = c_ref[l].astype(jnp.float32)      # (1, H)

        # gates = x W_ih + h W_hh + (b_ih + b_hh)   -> (1, 4H), lane-dense
        gates = (jnp.dot(x, wih_ref[l], preferred_element_type=jnp.float32)
                 + jnp.dot(h, whh_ref[l], preferred_element_type=jnp.float32)
                 + b_ref[l])

        # PyTorch LSTM cell (gate order i, f, g, o):
        #   i = sigmoid(.) ; f = sigmoid(.) ; g = tanh(.) ; o = sigmoid(.)
        #   c' = f * c + i * g ; h' = o * tanh(c')
        i_g = jax.nn.sigmoid(gates[:, 0 * H:1 * H])
        f_g = jax.nn.sigmoid(gates[:, 1 * H:2 * H])
        g_g = jnp.tanh(gates[:, 2 * H:3 * H])
        o_g = jax.nn.sigmoid(gates[:, 3 * H:4 * H])

        c_new = f_g * c + i_g * g_g
        h_new = o_g * jnp.tanh(c_new)

        h_new_ref[l] = h_new.astype(h_new_ref.dtype)
        c_new_ref[l] = c_new.astype(c_new_ref.dtype)
        x = h_new                              # next layer's input


def encoder_lstm_forward(token, hidden, params):
    """token: () int32; hidden: tuple (h, c) each (num_layers, 1, H) f32.
    Returns (output (1,1,H), (h_n, c_n)) — PyTorch EncoderLSTM.forward semantics."""
    h0, c0 = hidden
    emb = params["emb"]            # (vocab, 1, H)
    w_ih = params["w_ih"]          # (L, H, 4H)
    w_hh = params["w_hh"]          # (L, H, 4H)
    b = params["b"]                # (L, 1, 4H)
    num_layers, _, H = h0.shape

    tok = jnp.reshape(token, (1,)).astype(jnp.int32)

    grid_spec = pltpu.PrefetchScalarGridSpec(
        num_scalar_prefetch=1,
        grid=(1,),                                   # single step: all layers in-kernel
        in_specs=[
            pl.BlockSpec((1, 1, H), lambda i, tok: (tok[0], 0, 0)),       # emb row gather
            pl.BlockSpec((num_layers, 1, H), lambda i, tok: (0, 0, 0)),   # h
            pl.BlockSpec((num_layers, 1, H), lambda i, tok: (0, 0, 0)),   # c
            pl.BlockSpec((num_layers, H, 4 * H), lambda i, tok: (0, 0, 0)),  # W_ih fused
            pl.BlockSpec((num_layers, H, 4 * H), lambda i, tok: (0, 0, 0)),  # W_hh fused
            pl.BlockSpec((num_layers, 1, 4 * H), lambda i, tok: (0, 0, 0)),  # bias
        ],
        out_specs=[
            pl.BlockSpec((num_layers, 1, H), lambda i, tok: (0, 0, 0)),   # h_new
            pl.BlockSpec((num_layers, 1, H), lambda i, tok: (0, 0, 0)),   # c_new
        ],
        scratch_shapes=[],
    )

    h_new, c_new = pl.pallas_call(
        _lstm_encoder_kernel,
        grid_spec=grid_spec,
        out_shape=(
            jax.ShapeDtypeStruct((num_layers, 1, H), jnp.float32),
            jax.ShapeDtypeStruct((num_layers, 1, H), jnp.float32),
        ),
        compiler_params=pltpu.CompilerParams(
            dimension_semantics=("arbitrary",),      # sequential layer recurrence
        ),
    )(tok, emb, h0, c0, w_ih, w_hh, b)

    output = h_new[num_layers - 1][None]             # (1, 1, H) == seq_len=1 output
    return output, (h_new, c_new)


def encoder_lstm_reference(token, hidden, params):
    """Pure-JAX reference of the same forward pass (for correctness check)."""
    h0, c0 = hidden
    num_layers, _, H = h0.shape
    x = params["emb"][token, 0][None, :]             # (1, H)
    new_h, new_c = [], []
    for l in range(num_layers):
        h = h0[l]
        c = c0[l]
        gates = x @ params["w_ih"][l] + h @ params["w_hh"][l] + params["b"][l]
        i_g = jax.nn.sigmoid(gates[:, 0 * H:1 * H])
        f_g = jax.nn.sigmoid(gates[:, 1 * H:2 * H])
        g_g = jnp.tanh(gates[:, 2 * H:3 * H])
        o_g = jax.nn.sigmoid(gates[:, 3 * H:4 * H])
        c = f_g * c + i_g * g_g
        h = o_g * jnp.tanh(c)
        new_h.append(h)
        new_c.append(c)
        x = h
    return x[None], (jnp.stack(new_h, axis=0), jnp.stack(new_c, axis=0))


def init_params(key, vocab_size, hidden_size, num_layers):
    k_emb, k_wih, k_whh, k_bih, k_bhh = jax.random.split(key, 5)
    H = hidden_size
    bound = 1.0 / np.sqrt(H)   # PyTorch LSTM default init range
    b_ih = jax.random.uniform(k_bih, (num_layers, 4 * H), jnp.float32, -bound, bound)
    b_hh = jax.random.uniform(k_bhh, (num_layers, 4 * H), jnp.float32, -bound, bound)
    params = {
        "emb": jax.random.normal(k_emb, (vocab_size, 1, H), jnp.float32),
        # fused, pre-transposed gate weights: gate_pre = x @ W[l]  (gate order i,f,g,o)
        "w_ih": jax.random.uniform(k_wih, (num_layers, H, 4 * H), jnp.float32, -bound, bound),
        "w_hh": jax.random.uniform(k_whh, (num_layers, H, 4 * H), jnp.float32, -bound, bound),
        # LSTM adds both biases unscaled in every gate -> pre-sum host-side
        "b": (b_ih + b_hh)[:, None, :],
    }
    return params


if __name__ == "__main__":
    vocab_size = 16     # input_size
    hidden_size = 32    # hidden_size
    num_layers = 2

    key = jax.random.PRNGKey(0)
    params = init_params(key, vocab_size, hidden_size, num_layers)

    token = jnp.asarray(5, dtype=jnp.int32)                            # single token id
    hidden0 = (jnp.zeros((num_layers, 1, hidden_size), jnp.float32),   # initHidden()
               jnp.zeros((num_layers, 1, hidden_size), jnp.float32))

    out, (h_new, c_new) = encoder_lstm_forward(token, hidden0, params)
    out = jax.block_until_ready(out)
    h_new = jax.block_until_ready(h_new)
    c_new = jax.block_until_ready(c_new)

    out_ref, (h_ref, c_ref) = encoder_lstm_reference(token, hidden0, params)
    assert out.shape == (1, 1, hidden_size)
    assert h_new.shape == (num_layers, 1, hidden_size)
    assert c_new.shape == (num_layers, 1, hidden_size)
    np.testing.assert_allclose(np.asarray(out), np.asarray(out_ref), rtol=1e-5, atol=1e-5)
    np.testing.assert_allclose(np.asarray(h_new), np.asarray(h_ref), rtol=1e-5, atol=1e-5)
    np.testing.assert_allclose(np.asarray(c_new), np.asarray(c_ref), rtol=1e-5, atol=1e-5)

    print("KERNEL_OK")
</pallas_src>

<mosaic_0001>
module attributes {stable_mosaic.version = 11 : i64} {
  func.func @_lstm_encoder_kernel(%arg0: i32, %arg1: memref<1xi32, #tpu.memory_space<smem>>, %arg2: memref<1x1x32xf32, #tpu.memory_space<vmem>>, %arg3: memref<2x1x32xf32, #tpu.memory_space<vmem>>, %arg4: memref<2x1x32xf32, #tpu.memory_space<vmem>>, %arg5: memref<2x32x128xf32, #tpu.memory_space<vmem>>, %arg6: memref<2x32x128xf32, #tpu.memory_space<vmem>>, %arg7: memref<2x1x128xf32, #tpu.memory_space<vmem>>, %arg8: memref<2x1x32xf32, #tpu.memory_space<vmem>>, %arg9: memref<2x1x32xf32, #tpu.memory_space<vmem>>) attributes {dimension_semantics = [#tpu.dimension_semantics<arbitrary>], iteration_bounds = array<i64: 1>, scalar_prefetch = 1 : i64, scratch_operands = 0 : i64, tpu.core_type = #tpu.core_type<tc>, window_params = [{transform_indices = @transform_0, window_bounds = array<i64: 1, 1, 32>}, {pipeline_mode = #tpu.pipeline_mode<synchronous>, transform_indices = @transform_1, window_bounds = array<i64: 2, 1, 32>}, {pipeline_mode = #tpu.pipeline_mode<synchronous>, transform_indices = @transform_2, window_bounds = array<i64: 2, 1, 32>}, {pipeline_mode = #tpu.pipeline_mode<synchronous>, transform_indices = @transform_3, window_bounds = array<i64: 2, 32, 128>}, {pipeline_mode = #tpu.pipeline_mode<synchronous>, transform_indices = @transform_4, window_bounds = array<i64: 2, 32, 128>}, {pipeline_mode = #tpu.pipeline_mode<synchronous>, transform_indices = @transform_5, window_bounds = array<i64: 2, 1, 128>}, {pipeline_mode = #tpu.pipeline_mode<synchronous>, transform_indices = @transform_6, window_bounds = array<i64: 2, 1, 32>}, {pipeline_mode = #tpu.pipeline_mode<synchronous>, transform_indices = @transform_7, window_bounds = array<i64: 2, 1, 32>}]} {
    %c0 = arith.constant 0 : index
    %c0_0 = arith.constant 0 : index
    %c0_1 = arith.constant 0 : index
    %0 = vector.load %arg2[%c0, %c0_0, %c0_1] : memref<1x1x32xf32, #tpu.memory_space<vmem>>, vector<1x1x32xf32>
    %1 = vector.shape_cast %0 : vector<1x1x32xf32> to vector<1x32xf32>
    %c0_2 = arith.constant 0 : index
    %c0_3 = arith.constant 0 : index
    %c0_4 = arith.constant 0 : index
    %2 = vector.load %arg3[%c0_2, %c0_3, %c0_4] : memref<2x1x32xf32, #tpu.memory_space<vmem>>, vector<1x1x32xf32>
    %3 = vector.shape_cast %2 : vector<1x1x32xf32> to vector<1x32xf32>
    %c0_5 = arith.constant 0 : index
    %c0_6 = arith.constant 0 : index
    %c0_7 = arith.constant 0 : index
    %4 = vector.load %arg4[%c0_5, %c0_6, %c0_7] : memref<2x1x32xf32, #tpu.memory_space<vmem>>, vector<1x1x32xf32>
    %5 = vector.shape_cast %4 : vector<1x1x32xf32> to vector<1x32xf32>
    %c0_8 = arith.constant 0 : index
    %c0_9 = arith.constant 0 : index
    %c0_10 = arith.constant 0 : index
    %6 = vector.load %arg5[%c0_8, %c0_9, %c0_10] : memref<2x32x128xf32, #tpu.memory_space<vmem>>, vector<1x32x128xf32>
    %7 = vector.shape_cast %6 : vector<1x32x128xf32> to vector<32x128xf32>
    %cst = arith.constant dense<0.000000e+00> : vector<1x128xf32>
    %8 = tpu.matmul %1, %7, %cst {dimension_numbers = #tpu.dot_dimension_numbers<[1], [0], [0], [1], [0, 0, 1, 1], [], []>} : vector<1x32xf32>, vector<32x128xf32>, vector<1x128xf32> -> vector<1x128xf32>
    %c0_11 = arith.constant 0 : index
    %c0_12 = arith.constant 0 : index
    %c0_13 = arith.constant 0 : index
    %9 = vector.load %arg6[%c0_11, %c0_12, %c0_13] : memref<2x32x128xf32, #tpu.memory_space<vmem>>, vector<1x32x128xf32>
    %10 = vector.shape_cast %9 : vector<1x32x128xf32> to vector<32x128xf32>
    %cst_14 = arith.constant dense<0.000000e+00> : vector<1x128xf32>
    %11 = tpu.matmul %3, %10, %cst_14 {dimension_numbers = #tpu.dot_dimension_numbers<[1], [0], [0], [1], [0, 0, 1, 1], [], []>} : vector<1x32xf32>, vector<32x128xf32>, vector<1x128xf32> -> vector<1x128xf32>
    %12 = arith.addf %8, %11 : vector<1x128xf32>
    %c0_15 = arith.constant 0 : index
    %c0_16 = arith.constant 0 : index
    %c0_17 = arith.constant 0 : index
    %13 = vector.load %arg7[%c0_15, %c0_16, %c0_17] : memref<2x1x128xf32, #tpu.memory_space<vmem>>, vector<1x1x128xf32>
    %14 = vector.shape_cast %13 : vector<1x1x128xf32> to vector<1x128xf32>
    %15 = arith.addf %12, %14 : vector<1x128xf32>
    %16 = vector.extract_strided_slice %15 {offsets = [0, 0], sizes = [1, 32], strides = [1, 1]} : vector<1x128xf32> to vector<1x32xf32>
    %17 = arith.negf %16 : vector<1x32xf32>
    %18 = math.exp %17 : vector<1x32xf32>
    %cst_18 = arith.constant 1.000000e+00 : f32
    %19 = vector.broadcast %cst_18 : f32 to vector<1x32xf32>
    %20 = arith.addf %19, %18 : vector<1x32xf32>
    %21 = arith.divf %19, %20 : vector<1x32xf32>
    %22 = vector.extract_strided_slice %15 {offsets = [0, 32], sizes = [1, 32], strides = [1, 1]} : vector<1x128xf32> to vector<1x32xf32>
    %23 = arith.negf %22 : vector<1x32xf32>
    %24 = math.exp %23 : vector<1x32xf32>
    %cst_19 = arith.constant 1.000000e+00 : f32
    %25 = vector.broadcast %cst_19 : f32 to vector<1x32xf32>
    %26 = arith.addf %25, %24 : vector<1x32xf32>
    %27 = arith.divf %25, %26 : vector<1x32xf32>
    %28 = vector.extract_strided_slice %15 {offsets = [0, 64], sizes = [1, 32], strides = [1, 1]} : vector<1x128xf32> to vector<1x32xf32>
    %29 = math.tanh %28 : vector<1x32xf32>
    %30 = vector.extract_strided_slice %15 {offsets = [0, 96], sizes = [1, 32], strides = [1, 1]} : vector<1x128xf32> to vector<1x32xf32>
    %31 = arith.negf %30 : vector<1x32xf32>
    %32 = math.exp %31 : vector<1x32xf32>
    %cst_20 = arith.constant 1.000000e+00 : f32
    %33 = vector.broadcast %cst_20 : f32 to vector<1x32xf32>
    %34 = arith.addf %33, %32 : vector<1x32xf32>
    %35 = arith.divf %33, %34 : vector<1x32xf32>
    %36 = arith.mulf %27, %5 : vector<1x32xf32>
    %37 = arith.mulf %21, %29 : vector<1x32xf32>
    %38 = arith.addf %36, %37 : vector<1x32xf32>
    %39 = math.tanh %38 : vector<1x32xf32>
    %40 = arith.mulf %35, %39 : vector<1x32xf32>
    %c0_21 = arith.constant 0 : index
    %c0_22 = arith.constant 0 : index
    %c0_23 = arith.constant 0 : index
    %41 = vector.load %arg8[%c0_21, %c0_22, %c0_23] : memref<2x1x32xf32, #tpu.memory_space<vmem>>, vector<1x1x32xf32>
    %42 = vector.shape_cast %41 : vector<1x1x32xf32> to vector<1x32xf32>
    %43 = vector.shape_cast %40 : vector<1x32xf32> to vector<1x1x32xf32>
    tpu.vector_store %arg8[%c0_21, %c0_22, %c0_23], %43 {strides = array<i32>} : memref<2x1x32xf32, #tpu.memory_space<vmem>>, vector<1x1x32xf32>,
    %c0_24 = arith.constant 0 : index
    %c0_25 = arith.constant 0 : index
    %c0_26 = arith.constant 0 : index
    %44 = vector.load %arg9[%c0_24, %c0_25, %c0_26] : memref<2x1x32xf32, #tpu.memory_space<vmem>>, vector<1x1x32xf32>
    %45 = vector.shape_cast %44 : vector<1x1x32xf32> to vector<1x32xf32>
    %46 = vector.shape_cast %38 : vector<1x32xf32> to vector<1x1x32xf32>
    tpu.vector_store %arg9[%c0_24, %c0_25, %c0_26], %46 {strides = array<i32>} : memref<2x1x32xf32, #tpu.memory_space<vmem>>, vector<1x1x32xf32>,
    %c1 = arith.constant 1 : index
    %c0_27 = arith.constant 0 : index
    %c0_28 = arith.constant 0 : index
    %47 = vector.load %arg3[%c1, %c0_27, %c0_28] : memref<2x1x32xf32, #tpu.memory_space<vmem>>, vector<1x1x32xf32>
    %48 = vector.shape_cast %47 : vector<1x1x32xf32> to vector<1x32xf32>
    %c1_29 = arith.constant 1 : index
    %c0_30 = arith.constant 0 : index
    %c0_31 = arith.constant 0 : index
    %49 = vector.load %arg4[%c1_29, %c0_30, %c0_31] : memref<2x1x32xf32, #tpu.memory_space<vmem>>, vector<1x1x32xf32>
    %50 = vector.shape_cast %49 : vector<1x1x32xf32> to vector<1x32xf32>
    %c1_32 = arith.constant 1 : index
    %c0_33 = arith.constant 0 : index
    %c0_34 = arith.constant 0 : index
    %51 = vector.load %arg5[%c1_32, %c0_33, %c0_34] : memref<2x32x128xf32, #tpu.memory_space<vmem>>, vector<1x32x128xf32>
    %52 = vector.shape_cast %51 : vector<1x32x128xf32> to vector<32x128xf32>
    %cst_35 = arith.constant dense<0.000000e+00> : vector<1x128xf32>
    %53 = tpu.matmul %40, %52, %cst_35 {dimension_numbers = #tpu.dot_dimension_numbers<[1], [0], [0], [1], [0, 0, 1, 1], [], []>} : vector<1x32xf32>, vector<32x128xf32>, vector<1x128xf32> -> vector<1x128xf32>
    %c1_36 = arith.constant 1 : index
    %c0_37 = arith.constant 0 : index
    %c0_38 = arith.constant 0 : index
    %54 = vector.load %arg6[%c1_36, %c0_37, %c0_38] : memref<2x32x128xf32, #tpu.memory_space<vmem>>, vector<1x32x128xf32>
    %55 = vector.shape_cast %54 : vector<1x32x128xf32> to vector<32x128xf32>
    %cst_39 = arith.constant dense<0.000000e+00> : vector<1x128xf32>
    %56 = tpu.matmul %48, %55, %cst_39 {dimension_numbers = #tpu.dot_dimension_numbers<[1], [0], [0], [1], [0, 0, 1, 1], [], []>} : vector<1x32xf32>, vector<32x128xf32>, vector<1x128xf32> -> vector<1x128xf32>
    %57 = arith.addf %53, %56 : vector<1x128xf32>
    %c1_40 = arith.constant 1 : index
    %c0_41 = arith.constant 0 : index
    %c0_42 = arith.constant 0 : index
    %58 = vector.load %arg7[%c1_40, %c0_41, %c0_42] : memref<2x1x128xf32, #tpu.memory_space<vmem>>, vector<1x1x128xf32>
    %59 = vector.shape_cast %58 : vector<1x1x128xf32> to vector<1x128xf32>
    %60 = arith.addf %57, %59 : vector<1x128xf32>
    %61 = vector.extract_strided_slice %60 {offsets = [0, 0], sizes = [1, 32], strides = [1, 1]} : vector<1x128xf32> to vector<1x32xf32>
    %62 = arith.negf %61 : vector<1x32xf32>
    %63 = math.exp %62 : vector<1x32xf32>
    %cst_43 = arith.constant 1.000000e+00 : f32
    %64 = vector.broadcast %cst_43 : f32 to vector<1x32xf32>
    %65 = arith.addf %64, %63 : vector<1x32xf32>
    %66 = arith.divf %64, %65 : vector<1x32xf32>
    %67 = vector.extract_strided_slice %60 {offsets = [0, 32], sizes = [1, 32], strides = [1, 1]} : vector<1x128xf32> to vector<1x32xf32>
    %68 = arith.negf %67 : vector<1x32xf32>
    %69 = math.exp %68 : vector<1x32xf32>
    %cst_44 = arith.constant 1.000000e+00 : f32
    %70 = vector.broadcast %cst_44 : f32 to vector<1x32xf32>
    %71 = arith.addf %70, %69 : vector<1x32xf32>
    %72 = arith.divf %70, %71 : vector<1x32xf32>
    %73 = vector.extract_strided_slice %60 {offsets = [0, 64], sizes = [1, 32], strides = [1, 1]} : vector<1x128xf32> to vector<1x32xf32>
    %74 = math.tanh %73 : vector<1x32xf32>
    %75 = vector.extract_strided_slice %60 {offsets = [0, 96], sizes = [1, 32], strides = [1, 1]} : vector<1x128xf32> to vector<1x32xf32>
    %76 = arith.negf %75 : vector<1x32xf32>
    %77 = math.exp %76 : vector<1x32xf32>
    %cst_45 = arith.constant 1.000000e+00 : f32
    %78 = vector.broadcast %cst_45 : f32 to vector<1x32xf32>
    %79 = arith.addf %78, %77 : vector<1x32xf32>
    %80 = arith.divf %78, %79 : vector<1x32xf32>
    %81 = arith.mulf %72, %50 : vector<1x32xf32>
    %82 = arith.mulf %66, %74 : vector<1x32xf32>
    %83 = arith.addf %81, %82 : vector<1x32xf32>
    %84 = math.tanh %83 : vector<1x32xf32>
    %85 = arith.mulf %80, %84 : vector<1x32xf32>
    %c1_46 = arith.constant 1 : index
    %c0_47 = arith.constant 0 : index
    %c0_48 = arith.constant 0 : index
    %86 = vector.load %arg8[%c1_46, %c0_47, %c0_48] : memref<2x1x32xf32, #tpu.memory_space<vmem>>, vector<1x1x32xf32>
    %87 = vector.shape_cast %86 : vector<1x1x32xf32> to vector<1x32xf32>
    %88 = vector.shape_cast %85 : vector<1x32xf32> to vector<1x1x32xf32>
    tpu.vector_store %arg8[%c1_46, %c0_47, %c0_48], %88 {strides = array<i32>} : memref<2x1x32xf32, #tpu.memory_space<vmem>>, vector<1x1x32xf32>,
    %c1_49 = arith.constant 1 : index
    %c0_50 = arith.constant 0 : index
    %c0_51 = arith.constant 0 : index
    %89 = vector.load %arg9[%c1_49, %c0_50, %c0_51] : memref<2x1x32xf32, #tpu.memory_space<vmem>>, vector<1x1x32xf32>
    %90 = vector.shape_cast %89 : vector<1x1x32xf32> to vector<1x32xf32>
    %91 = vector.shape_cast %83 : vector<1x32xf32> to vector<1x1x32xf32>
    tpu.vector_store %arg9[%c1_49, %c0_50, %c0_51], %91 {strides = array<i32>} : memref<2x1x32xf32, #tpu.memory_space<vmem>>, vector<1x1x32xf32>,
    return
  }
  func.func @transform_0(%arg0: i32, %arg1: memref<1xi32, #tpu.memory_space<smem>>) -> (i32, i32, i32) {
    %c0 = arith.constant 0 : index
    %0 = memref.load %arg1[%c0] : memref<1xi32, #tpu.memory_space<smem>>
    %c0_i32 = arith.constant 0 : i32
    %c0_i32_0 = arith.constant 0 : i32
    %c0_i32_1 = arith.constant 0 : i32
    return %0, %c0_i32, %c0_i32_0 : i32, i32, i32
  }
  func.func @transform_1(%arg0: i32, %arg1: memref<1xi32, #tpu.memory_space<smem>>) -> (i32, i32, i32) {
    %c0_i32 = arith.constant 0 : i32
    %c0_i32_0 = arith.constant 0 : i32
    %c0_i32_1 = arith.constant 0 : i32
    %c0_i32_2 = arith.constant 0 : i32
    return %c0_i32, %c0_i32_0, %c0_i32_1 : i32, i32, i32
  }
  func.func @transform_2(%arg0: i32, %arg1: memref<1xi32, #tpu.memory_space<smem>>) -> (i32, i32, i32) {
    %c0_i32 = arith.constant 0 : i32
    %c0_i32_0 = arith.constant 0 : i32
    %c0_i32_1 = arith.constant 0 : i32
    %c0_i32_2 = arith.constant 0 : i32
    return %c0_i32, %c0_i32_0, %c0_i32_1 : i32, i32, i32
  }
  func.func @transform_3(%arg0: i32, %arg1: memref<1xi32, #tpu.memory_space<smem>>) -> (i32, i32, i32) {
    %c0_i32 = arith.constant 0 : i32
    %c0_i32_0 = arith.constant 0 : i32
    %c0_i32_1 = arith.constant 0 : i32
    %c0_i32_2 = arith.constant 0 : i32
    return %c0_i32, %c0_i32_0, %c0_i32_1 : i32, i32, i32
  }
  func.func @transform_4(%arg0: i32, %arg1: memref<1xi32, #tpu.memory_space<smem>>) -> (i32, i32, i32) {
    %c0_i32 = arith.constant 0 : i32
    %c0_i32_0 = arith.constant 0 : i32
    %c0_i32_1 = arith.constant 0 : i32
    %c0_i32_2 = arith.constant 0 : i32
    return %c0_i32, %c0_i32_0, %c0_i32_1 : i32, i32, i32
  }
  func.func @transform_5(%arg0: i32, %arg1: memref<1xi32, #tpu.memory_space<smem>>) -> (i32, i32, i32) {
    %c0_i32 = arith.constant 0 : i32
    %c0_i32_0 = arith.constant 0 : i32
    %c0_i32_1 = arith.constant 0 : i32
    %c0_i32_2 = arith.constant 0 : i32
    return %c0_i32, %c0_i32_0, %c0_i32_1 : i32, i32, i32
  }
  func.func @transform_6(%arg0: i32, %arg1: memref<1xi32, #tpu.memory_space<smem>>) -> (i32, i32, i32) {
    %c0_i32 = arith.constant 0 : i32
    %c0_i32_0 = arith.constant 0 : i32
    %c0_i32_1 = arith.constant 0 : i32
    %c0_i32_2 = arith.constant 0 : i32
    return %c0_i32, %c0_i32_0, %c0_i32_1 : i32, i32, i32
  }
  func.func @transform_7(%arg0: i32, %arg1: memref<1xi32, #tpu.memory_space<smem>>) -> (i32, i32, i32) {
    %c0_i32 = arith.constant 0 : i32
    %c0_i32_0 = arith.constant 0 : i32
    %c0_i32_1 = arith.constant 0 : i32
    %c0_i32_2 = arith.constant 0 : i32
    return %c0_i32, %c0_i32_0, %c0_i32_1 : i32, i32, i32
  }
}

</mosaic_0001>

<bundles_post_ra>
// kernel: tpu_custom_call.1
= control target key start
LH: loop header
LB: loop body
LE: loop exit
PB: predicated region body
PF: predicated region fallthrough
CT: control target
= control target key end

     0   :  { %15 = vsyncpa [#allocation5], 0  ;;  %s681_s0 = inlined_call_operand.<no memory space> [shape: s32[1], index: 0, kind: input, shape index: {}]   ;;  %s682_s1 = inlined_call_operand.hbm [shape: f32[16,1,32], index: 1, kind: input, shape index: {}]   ;;  %s683_s2 = inlined_call_operand.vmem [shape: f32[2,1,32], index: 2, kind: input, shape index: {}]   ;;  %s684_s3 = inlined_call_operand.hbm [shape: f32[2,1,32], index: 3, kind: input, shape index: {}]   ;;  %s685_s4 = inlined_call_operand.hbm [shape: f32[2,32,128], index: 4, kind: input, shape index: {}]   ;;  %s686_s5 = inlined_call_operand.hbm [shape: f32[2,32,128], index: 5, kind: input, shape index: {}]   ;;  %s687_s6 = inlined_call_operand.vmem [shape: f32[2,1,128], index: 6, kind: input, shape index: {}]   ;;  %s688_s7 = inlined_call_operand.hbm [shape: f32[2,1,32], index: 7, kind: output, shape index: {0}]   ;;  %s689_s8 = inlined_call_operand.hbm [shape: f32[2,1,32], index: 8, kind: output, shape index: {1}]  }
   0x1   :  { %16 = vsyncpa [#allocation8], 0 }
   0x2   :  { %17 = vsyncpa [#allocation11], 0 }
   0x3   :  { %18 = vsyncpa [#allocation6], 0  ;;  %s39_s29 = sshll.u32 %s684_s3, 4  ;;  %s40_s29 = int_to_ptr.hbm [resolvable:$true] %s39_s29 }
   0x4   :  { %19 = vsyncpa [#allocation14], 0  ;;  %s555_s30 = smov [#allocation7]   ;;  %s25_s14 = scalar_lea.hbm %s682_s1, %s681_s0 }
   0x5   :  { %s41_s9 = sshll.u32 %s555_s30, 4  ;;  %s556_s15 = smov 16   ;;  %s42_s9 = int_to_ptr.vmem [resolvable:$true] %s41_s9 }
   0x6   :  { %s557_s16 = smov 1   ;;  %s27_s17 = sshll.u32 %s25_s14, 4  ;;  %s28_s17 = int_to_ptr.hbm [resolvable:$true] %s27_s17 }
   0x7   :  { %47 = dma.hbm_to_vmem [thread:$0]  %s40_s29, 32, %s42_s9, [#allocation8], %s556_s15, %s556_s15, %s557_s16  }
   0x8   :  { %s558_s3 = smov [#allocation4]   ;;  %s52_s21 = sshll.u32 %s685_s4, 4  ;;  %s53_s21 = int_to_ptr.hbm [resolvable:$true] %s52_s21 }
   0x9   :  { %s29_s18 = sshll.u32 %s558_s3, 4  ;;  %s425_s22 = sshra.s32 %s28_s17, 4  ;;  %s30_s18 = int_to_ptr.vmem [resolvable:$true] %s29_s18  ;;  %s426_s22 = int_to_ptr.hbm [resolvable:$true] %s425_s22 }
   0xa   :  { %s427_s23 = scalar_lea.hbm %s426_s22, 1  ;;  %s429_s25 = scalar_lea.hbm %s682_s1, 16 }
   0xb   :  { %p428_p0 = scmp.ne.s32.totalorder %s426_s22, %s427_s23  ;;  %p430_p1 = scmp.lt.s32.totalorder %s426_s22, %s682_s1 }
   0xc   :  { %p431_p2 = scmp.lt.s32.totalorder %s429_s25, %s427_s23 }
   0xe   :  { %p432_p3 = por %p431_p2, %p430_p1 }
  0x10   :  { %p433_p4 = pnand %p432_p3, %p428_p0 }
  0x12   :  { %436 = shalt.err (!%p433_p4)
}
  0x13   :  { %32 = dma.hbm_to_vmem [thread:$0]  %s28_s17, 16, %s30_s18, [#allocation5]  }
  0x14   :  { %s559_s28 = smov [#allocation9]   ;;  %s560_s29 = smov 128  }
  0x15   :  { %s54_s4 = sshll.u32 %s559_s28, 4  ;;  %s561_s30 = smov 8   ;;  %s55_s4 = int_to_ptr.vmem [resolvable:$true] %s54_s4 }
  0x16   :  { %60 = dma.hbm_to_vmem [thread:$0]  %s53_s21, 1024, %s55_s4, [#allocation8], %s560_s29, %s560_s29, %s561_s30  }
  0x17   :  { %s65_s11 = sshll.u32 %s686_s5, 4  ;;  %s562_s12 = smov [#allocation10]   ;;  %s66_s11 = int_to_ptr.hbm [resolvable:$true] %s65_s11 }
  0x18   :  { %s67_s13 = sshll.u32 %s562_s12, 4  ;;  %s68_s13 = int_to_ptr.vmem [resolvable:$true] %s67_s13 }
  0x19   :  { %73 = dma.hbm_to_vmem [thread:$0]  %s66_s11, 1024, %s68_s13, [#allocation11], %s560_s29, %s560_s29, %s561_s30  }
  0x1a   :  { %545 = dma.done.wait [#allocation5], 16  }
  0x1b   :  { %546 = vsyncadd [#allocation5], 4294967280 }
  0x1c   :  { %547 = dma.done.wait [#allocation8], 1056  }
  0x1d   :  { %548 = vsyncadd [#allocation8], 4294966240 }
  0x1e   :  { %549 = dma.done.wait [#allocation11], 1024  }
  0x1f   :  { %550 = vsyncadd [#allocation11], 4294966272  ;;  %v103_v0 = vld [vmem:[#allocation10 + $0x18] sm:$0xff]  ;;  %v102_v2 = vld [vmem:[#allocation10 + $0x10] sm:$0xff]  ;;  %vm104_vm0 = vcmask 261120   ;;  %s563_s3 = smov 64  }
  0x20   :  { %v99_v1 = vld [vmem:[#allocation9 + $0x18] sm:$0xff]  ;;  %120 = vmatpush.msra.mxu0 %v103_v0  ;;  %v98_v3 = vld [vmem:[#allocation9 + $0x10] sm:$0xff]  ;;  %v101_v4 = vld [vmem:[#allocation10 + $0x8] sm:$0xff]  ;;  %s564_s18 = smov 32   ;;  %s565_s19 = smov 96   ;;  %vm199_vm5 = vcmask 253952  }
  0x21   :  { %143 = vmatpush.msra.mxu1 %v99_v1  ;;  %v97_v5 = vld [vmem:[#allocation9 + $0x8] sm:$0xff]  ;;  %v100_v6 = vld [vmem:[#allocation10] sm:$0xff]  ;;  %v94_v8 = vld [vmem:[%s683_s2] sm:$0x1]  ;;  %s341_s25 = sshll.u32 %s689_s8, 4  ;;  %s567_s26 = smov [#allocation12]   ;;  %s342_s25 = int_to_ptr.hbm [resolvable:$true] %s341_s25 }
  0x22   :  { %121 = vmatpush.msra.mxu0 %v102_v2  ;;  %v96_v7 = vld [vmem:[#allocation9] sm:$0xff]  ;;  %v93_v9 = vld [vmem:[#allocation4] sm:$0x1]  ;;  %v383_v16 = vld [vmem:[#allocation7] ss:$0 sm:$0xff]  ;;  %s326_s27 = sshll.u32 %s567_s26, 4  ;;  %s327_s27 = int_to_ptr.vmem [resolvable:$true] %s326_s27 }
  0x23   :  { %144 = vmatpush.msra.mxu1 %v98_v3  ;;  %v151_v12 = vld [vmem:[%s687_s6] sm:$0x1]  ;;  %v384_v20 = vld [vmem:[#allocation7 + $0x1] ss:$0 sm:$0xff]  ;;  %v218_v40 = vld [vmem:[#allocation10 + $0x30] sm:$0xff]  ;;  %s328_s29 = sshll.u32 %s688_s7, 4  ;;  %s329_s29 = int_to_ptr.hbm [resolvable:$true] %s328_s29 }
  0x24   :  { %122 = vmatpush.msra.mxu0 %v101_v4  ;;  %v219_v38 = vld [vmem:[#allocation10 + $0x38] sm:$0xff]  ;;  %v213_v41 = vld [vmem:[#allocation9 + $0x30] sm:$0xff]  ;;  %v217_v42 = vld [vmem:[#allocation10 + $0x28] sm:$0xff] }
  0x25   :  { %145 = vmatpush.msra.mxu1 %v97_v5  ;;  %v214_v39 = vld [vmem:[#allocation9 + $0x38] sm:$0xff]  ;;  %235 = vmatpush.msra.mxu2 %v219_v38  ;;  %v212_v43 = vld [vmem:[#allocation9 + $0x28] sm:$0xff]  ;;  %v216_v44 = vld [vmem:[#allocation10 + $0x20] sm:$0xff] }
  0x26   :  { %123 = vmatpush.msra.mxu0 %v100_v6  ;;  %257 = vmatpush.msra.mxu3 %v214_v39  ;;  %v211_v45 = vld [vmem:[#allocation9 + $0x20] sm:$0xff]  ;;  %v365_v50 = vld [vmem:[%s683_s2 + $0x1] sm:$0x1]  ;;  %s566_s2 = smov [#allocation13]  }
  0x27   :  { %146 = vmatpush.msra.mxu1 %v96_v7  ;;  %362 = vmatmul.msk.f32.vlgmr.msra.gmra.mxu0 %vm104_vm0, %v94_v8  ;;  %v368_v54 = vld [vmem:[%s687_s6 + $0x1] sm:$0x1]  ;;  %s339_s6 = sshll.u32 %s566_s2, 4  ;;  %s340_s6 = int_to_ptr.vmem [resolvable:$true] %s339_s6 }
  0x28   :  { %363 = vmatmul.msk.f32.vlgmr.msra.gmra.mxu1 %vm104_vm0, %v93_v9  ;;  %236 = vmatpush.msra.mxu2 %v218_v40 }
  0x29   :  { %258 = vmatpush.msra.mxu3 %v213_v41 }
  0x2a   :  { %237 = vmatpush.msra.mxu2 %v217_v42 }
  0x2b   :  { %259 = vmatpush.msra.mxu3 %v212_v43 }
  0x2c   :  { %238 = vmatpush.msra.mxu2 %v216_v44 }
  0x2d   :  { %260 = vmatpush.msra.mxu3 %v211_v45  ;;  %366 = vmatmul.msk.f32.vlgmr.msra.gmra.mxu2 %vm104_vm0, %v365_v50 }
  0xa4   :  { %v125_v10 = vpop.f32.mrf.mxu0 }
  0xa5   :  { %v148_v11 = vpop.f32.mrf.mxu1 }
  0xa6   :  { %v149_v13 = vadd.f32 %v148_v11, %v125_v10 }
  0xa8   :  { %v152_v14 = vadd.f32 %v151_v12, %v149_v13 }
  0xaa   :  { %385 = vtanh.f32 %v152_v14  ;;  %v364_v17 = vmul.f32 -1.442695, %v152_v14 }
  0xac   :  { %387 = vpow2.f32 %v364_v17 }
  0xb0   :  { %v386_v15 = vpop.eup %385  ;;  %v240_v52 = vpop.f32.mrf.mxu2 }
  0xb1   :  { %180 = vrot.lane.b32.xlu0 %v386_v15, %s563_s3 }
  0xb2   :  { %v388_v18 = vpop.eup %387 }
  0xb3   :  { %v156_v19 = vadd.f32 1.0, %v388_v18 }
  0xb5   :  { %389 = vrcp.f32 %v156_v19  ;;  %v168_v26 = vand.u32 2147483648, %v156_v19  ;;  %vm162_vm2 = vweird.f32 %v156_v19  ;;  %v166_v27 = vand.u32 2147483647, %v156_v19 }
  0xb7   :  { %v169_v29 = vor.u32 1.1754944e-38, %v168_v26  ;;  %vm167_vm4 = vcmp.eq.f32.partialorder %v166_v27, 8.507059e+37 }
  0xb9   :  { %175 = vrot.lane.b32.xlu0 %v383_v16, %s564_s18 }
  0xbb   :  { %v390_v21 = vpop.eup %389 }
  0xbc   :  { %v158_v22 = vmul.f32 %v390_v21, %v156_v19  ;;  %vm163_vm1 = vweird.f32 %v390_v21 }
  0xbd   :  { %vm164_vm3 = vmor %vm162_vm2, %vm163_vm1 }
  0xbe   :  { %v159_v23 = vsub.f32 1.0, %v158_v22 }
  0xc0   :  { %v160_v24 = vmul.f32 %v390_v21, %v159_v23 }
  0xc1   :  { %290 = vrot.lane.b32.xlu0 %v384_v20, %s564_s18 }
  0xc2   :  { %v161_v25 = vadd.f32 %v390_v21, %v160_v24 }
  0xc4   :  { %v165_v28 = vsel %vm164_vm3, %v390_v21, %v161_v25 }
  0xc5   :  { %v170_v31 = vsel %vm167_vm4, %v169_v29, %v165_v28 }
 0x123   :  { %v181_v30 = vpop.permute.xlu0 %180 }
 0x124   :  { %v183_v32 = vmul.f32 %v181_v30, %v170_v31 }
 0x126   :  { %185 = vrot.lane.b32.xlu1 %v183_v32, %s564_s18 }
 0x12b   :  { %v176_v33 = vpop.permute.xlu0 %175 }
 0x12c   :  { %v178_v34 = vmul.f32 %v176_v33, %v170_v31 }
 0x133   :  { %v291_v46 = vpop.permute.xlu0 %290 }
 0x198   :  { %v186_v35 = vpop.permute.xlu1 %185 }
 0x199   :  { %v188_v36 = vadd.f32 %v186_v35, %v178_v34 }
 0x19b   :  { %391 = vtanh.f32 %v188_v36  ;;  %202 = vrot.lane.b32.xlu0 %v188_v36, %s565_s19 }
 0x1a1   :  { %v392_v37 = vpop.eup %391 }
 0x1a2   :  { %191 = vrot.lane.b32.xlu1 %v392_v37, %s563_s3 }
 0x20d   :  { %v203_v47 = vpop.permute.xlu0 %202 }
 0x20e   :  { %205 = vst.msk [vmem:[#allocation13] sm:$0x1] %vm199_vm5, %v203_v47 }
 0x214   :  { %v192_v48 = vpop.permute.xlu1 %191 }
 0x215   :  { %v194_v49 = vmul.f32 %v192_v48, %v170_v31 }
 0x217   :  { %196 = vrot.lane.b32.xlu2 %v194_v49, %s564_s18 }
 0x271   :  { %v197_v51 = vpop.permute.xlu2 %196 }
 0x272   :  { %200 = vst.msk [vmem:[#allocation12] sm:$0x1] %vm199_vm5, %v197_v51  ;;  %367 = vmatmul.msk.f32.vlgmr.msra.gmra.mxu3 %vm104_vm0, %v197_v51 }
 0x2f5   :  { %v262_v53 = vpop.f32.mrf.mxu3 }
 0x2f6   :  { %v263_v55 = vadd.f32 %v262_v53, %v240_v52 }
 0x2f8   :  { %v267_v56 = vadd.f32 %v368_v54, %v263_v55 }
 0x2fa   :  { %393 = vtanh.f32 %v267_v56  ;;  %v369_v58 = vmul.f32 -1.442695, %v267_v56 }
 0x2fc   :  { %395 = vpow2.f32 %v369_v58 }
 0x300   :  { %v394_v57 = vpop.eup %393 }
 0x301   :  { %295 = vrot.lane.b32.xlu2 %v394_v57, %s563_s3 }
 0x302   :  { %v396_v59 = vpop.eup %395 }
 0x303   :  { %v271_v60 = vadd.f32 1.0, %v396_v59 }
 0x305   :  { %397 = vrcp.f32 %v271_v60  ;;  %v283_v2 = vand.u32 2147483648, %v271_v60  ;;  %vm277_vm7 = vweird.f32 %v271_v60  ;;  %v281_v3 = vand.u32 2147483647, %v271_v60 }
 0x307   :  { %v284_v5 = vor.u32 1.1754944e-38, %v283_v2  ;;  %vm282_vm9 = vcmp.eq.f32.partialorder %v281_v3, 8.507059e+37 }
 0x30b   :  { %v398_v61 = vpop.eup %397 }
 0x30c   :  { %v273_v62 = vmul.f32 %v398_v61, %v271_v60  ;;  %vm278_vm6 = vweird.f32 %v398_v61 }
 0x30d   :  { %vm279_vm8 = vmor %vm277_vm7, %vm278_vm6 }
 0x30e   :  { %v274_v63 = vsub.f32 1.0, %v273_v62 }
 0x310   :  { %v275_v0 = vmul.f32 %v398_v61, %v274_v63 }
 0x312   :  { %v276_v1 = vadd.f32 %v398_v61, %v275_v0 }
 0x314   :  { %v280_v4 = vsel %vm279_vm8, %v398_v61, %v276_v1 }
 0x315   :  { %v285_v7 = vsel %vm282_vm9, %v284_v5, %v280_v4 }
 0x316   :  { %v293_v9 = vmul.f32 %v291_v46, %v285_v7 }
 0x35b   :  { %v296_v6 = vpop.permute.xlu2 %295 }
 0x35c   :  { %v298_v8 = vmul.f32 %v296_v6, %v285_v7 }
 0x35e   :  { %300 = vrot.lane.b32.xlu1 %v298_v8, %s564_s18 }
 0x3d0   :  { %v301_v10 = vpop.permute.xlu1 %300 }
 0x3d1   :  { %v303_v11 = vadd.f32 %v301_v10, %v293_v9 }
 0x3d3   :  { %399 = vtanh.f32 %v303_v11 }
 0x3d9   :  { %v400_v12 = vpop.eup %399 }
 0x3da   :  { %306 = vrot.lane.b32.xlu2 %v400_v12, %s563_s3 }
 0x3e2   :  { %317 = vrot.lane.b32.xlu2 %v303_v11, %s565_s19 }
 0x434   :  { %v307_v13 = vpop.permute.xlu2 %306 }
 0x435   :  { %v309_v14 = vmul.f32 %v307_v13, %v285_v7 }
 0x437   :  { %311 = vrot.lane.b32.xlu1 %v309_v14, %s564_s18 }
 0x43c   :  { %v318_v15 = vpop.permute.xlu2 %317 }
 0x43d   :  { %321 = vst.msk [vmem:[#allocation13 + $0x1] sm:$0x1] %vm199_vm5, %v318_v15 }
 0x43e   :  { %347 = dma.vmem_to_hbm [thread:$0]  %s340_s6, 32, %s342_s25, [#allocation14], %s556_s15, %s556_s15, %s557_s16  }
 0x4a9   :  { %v312_v16 = vpop.permute.xlu1 %311 }
 0x4aa   :  { %315 = vst.msk [vmem:[#allocation12 + $0x1] sm:$0x1] %vm199_vm5, %v312_v16 }
 0x4ab   :  { %334 = dma.vmem_to_hbm [thread:$0]  %s327_s27, 32, %s329_s29, [#allocation6], %s556_s15, %s556_s15, %s557_s16  }
 0x4ac   :  { %551 = dma.done.wait [#allocation6], 32  }
 0x4ad   :  { %552 = vsyncadd [#allocation6], 4294967264 }
 0x4ae   :  { %553 = dma.done.wait [#allocation14], 32  }
 0x4af   :  { %554 = vsyncadd [#allocation14], 4294967264 }
 0x4b0   :  { %356 = vsyncpa [#allocation5], 1 }
 0x4b1   :  { %357 = vsyncpa [#allocation8], 1 }
 0x4b2   :  { %358 = vsyncpa [#allocation11], 1 }
 0x4b3   :  { %359 = vsyncpa [#allocation6], 1 }
 0x4b4   :  { %360 = vsyncpa [#allocation14], 1 }

</bundles_post_ra>
